<compile_context>
chip_gen: v5e
topology: v5e:2x2
jax: 0.10.0
libtpu: 0.0.40
codegen_flags: <defaults>
</compile_context>

<pallas_src>
import jax
import jax.numpy as jnp
from jax.experimental import pallas as pl
from jax.experimental.pallas import tpu as pltpu


_LANE = 128
_TARGET_TILE_BYTES = 2 * 1024 * 1024   # per (w, d) tile pair; ~85% of HBM roofline already
_MAX_SINGLE_C = 4096                   # widest column extent kept as one full-dim block
_MIN_GRID_STEPS = 8                    # >= 8 row blocks when possible: pipelining + v7x 2 TCs


def _round_up(x, m):
    return (x + m - 1) // m * m


def _masked_product_sum(x, y):
    """sum(x * y) over all elements of two identically shaped 2-D arrays."""
    assert x.shape == y.shape and x.ndim == 2
    R, C = x.shape
    x_item = jnp.dtype(x.dtype).itemsize
    y_item = jnp.dtype(y.dtype).itemsize
    # Sublane row quantum: 8 rows for 4-byte dtypes, 16 for bf16, 32 for int8.
    row_quantum = 8 * max(1, 4 // min(x_item, y_item))

    # ---- column (lane) tiling ----------------------------------------------
    if C <= _MAX_SINGLE_C:
        LC, nbc = C, 1                 # full-dim block: always a legal block width
    else:
        LC = 4 * _LANE                 # 512-wide lane-dense tiles for very wide inputs
        nbc = pl.cdiv(C, LC)

    # ---- row (sublane) tiling ----------------------------------------------
    pair_row_bytes = LC * (x_item + y_item)          # one row of one (x, y) tile pair
    tr_cap = max(row_quantum,
                 (_TARGET_TILE_BYTES // pair_row_bytes) // row_quantum * row_quantum)
    tr_grid = _round_up(pl.cdiv(R, _MIN_GRID_STEPS), row_quantum)
    TR = max(row_quantum, min(tr_cap, tr_grid, _round_up(R, row_quantum)))
    nbr = pl.cdiv(R, TR)

    need_row_mask = (R % TR) != 0
    need_col_mask = nbc > 1 and (C % LC) != 0

    def kernel(x_ref, y_ref, out_ref):
        # Multiply in the (promoted) input dtype — bf16 stays packed on the
        # VPU — and only the partial sums are carried in f32.
        prod = (x_ref[...] * y_ref[...]).astype(jnp.float32)
        if need_row_mask or need_col_mask:
            mask = None
            if need_row_mask:
                rows = jax.lax.broadcasted_iota(jnp.int32, prod.shape, 0)
                mask = (rows + pl.program_id(0) * TR) < R
            if need_col_mask:
                cols = jax.lax.broadcasted_iota(jnp.int32, prod.shape, 1)
                cmask = (cols + pl.program_id(1) * LC) < C
                mask = cmask if mask is None else (mask & cmask)
            prod = jnp.where(mask, prod, 0.0)
        # Reduce rows only (VALU vreg adds); emit a lane-dense per-block partial.
        out_ref[...] = jnp.sum(prod, axis=0).reshape(1, 1, LC)

    # VMEM accounting, applied once: (x tile + y tile) x 2 pipeline buffers.
    resident_bytes = 2 * TR * LC * (x_item + y_item)
    vmem_limit = min(48 * 1024 * 1024,                       # headroom under v7x's 64 MiB/TC
                     max(16 * 1024 * 1024, resident_bytes + 2 * 1024 * 1024))

    partials = pl.pallas_call(
        kernel,
        out_shape=jax.ShapeDtypeStruct((nbr, 1, nbc * LC), jnp.float32),
        grid_spec=pltpu.PrefetchScalarGridSpec(
            num_scalar_prefetch=0,
            grid=(nbr, nbc),
            in_specs=[
                pl.BlockSpec((TR, LC), lambda i, j: (i, j)),
                pl.BlockSpec((TR, LC), lambda i, j: (i, j)),
            ],
            out_specs=pl.BlockSpec((1, 1, LC), lambda i, j: (i, 0, j)),
        ),
        compiler_params=pltpu.CompilerParams(
            # Independent per-block partials -> both grid axes shardable
            # across TensorCores / DMA engines.
            dimension_semantics=("parallel", "parallel"),
            vmem_limit_bytes=int(vmem_limit),
        ),
        cost_estimate=pl.CostEstimate(
            flops=2 * R * C,
            transcendentals=0,
            bytes_accessed=R * C * (x_item + y_item) + nbr * nbc * LC * 4,
        ),
    )(x, y)

    # Tiny finish: cross-lane + cross-block reduce of the f32 partials.
    return jnp.sum(partials)


def som_loss(weights: jax.Array, distances: jax.Array) -> jax.Array:
    """Pallas implementation of SOMLoss.forward(weights, distances)."""
    assert weights.shape == distances.shape and weights.ndim == 2
    B, N = weights.shape
    total_elems = B * N

    if N % _LANE != 0 and total_elems % _LANE == 0:
        # Lane-dense flatten: loss = (1/B) * sum over ALL elements of w*d, so a
        # free row-major reshape to (M, L) with L a multiple of 128 gives 100%
        # lane utilization regardless of the SOM node count.
        L = _LANE
        for cand in (8 * _LANE, 4 * _LANE, 2 * _LANE, _LANE):
            if total_elems % cand == 0:
                L = cand
                break
        M = total_elems // L
        total = _masked_product_sum(weights.reshape(M, L), distances.reshape(M, L))
    else:
        # N already lane-aligned, or B*N can't be re-tiled for free.  In the
        # latter (rare) case the full-width block carries some masked lanes;
        # acceptable for a loss-sized reduction.
        total = _masked_product_sum(weights, distances)

    return total / B


if __name__ == "__main__":
    key = jax.random.PRNGKey(0)

    def check(B, N, k):
        kw, kd = jax.random.split(k)
        w = jax.random.uniform(kw, (B, N), dtype=jnp.float32)
        w = w / jnp.sum(w, axis=1, keepdims=True)   # SOM soft-assignment rows sum to 1
        d = jax.random.uniform(kd, (B, N), dtype=jnp.float32)
        loss = som_loss(w, d)
        jax.block_until_ready(loss)
        ref = jnp.mean(jnp.sum(w * d, axis=1))
        assert jnp.allclose(loss, ref, rtol=1e-5, atol=1e-6), (B, N, loss, ref)

    k1, k2, k3 = jax.random.split(key, 3)
    check(8, 128, k1)     # single block, fully lane/sublane aligned
    check(100, 256, k2)   # multi-block grid + in-kernel tail-row masking
    check(64, 100, k3)    # N not a multiple of 128 -> lane-dense flatten path

    print("KERNEL_OK")
</pallas_src>

<mosaic_0001>
module attributes {stable_mosaic.version = 11 : i64} {
  func.func @kernel(%arg0: i32, %arg1: i32, %arg2: memref<8x128xf32, #tpu.memory_space<vmem>>, %arg3: memref<8x128xf32, #tpu.memory_space<vmem>>, %arg4: memref<1x1x128xf32, #tpu.memory_space<vmem>>) attributes {dimension_semantics = [#tpu.dimension_semantics<parallel>, #tpu.dimension_semantics<parallel>], iteration_bounds = array<i64: 1, 1>, scalar_prefetch = 0 : i64, scratch_operands = 0 : i64, tpu.core_type = #tpu.core_type<tc>, window_params = [{transform_indices = @transform_0, window_bounds = array<i64: 8, 128>}, {transform_indices = @transform_1, window_bounds = array<i64: 8, 128>}, {transform_indices = @transform_2, window_bounds = array<i64: 1, 1, 128>}]} {
    %c0 = arith.constant 0 : index
    %c0_0 = arith.constant 0 : index
    %0 = vector.load %arg2[%c0, %c0_0] : memref<8x128xf32, #tpu.memory_space<vmem>>, vector<8x128xf32>
    %c0_1 = arith.constant 0 : index
    %c0_2 = arith.constant 0 : index
    %1 = vector.load %arg3[%c0_1, %c0_2] : memref<8x128xf32, #tpu.memory_space<vmem>>, vector<8x128xf32>
    %2 = arith.mulf %0, %1 : vector<8x128xf32>
    %cst = arith.constant dense<0.000000e+00> : vector<128xf32>
    %3 = vector.multi_reduction <add>, %2, %cst [0] : vector<8x128xf32> to vector<128xf32>
    %4 = vector.shape_cast %3 : vector<128xf32> to vector<1x1x128xf32>
    %c0_3 = arith.constant 0 : index
    %c0_4 = arith.constant 0 : index
    %c0_5 = arith.constant 0 : index
    %5 = vector.load %arg4[%c0_3, %c0_4, %c0_5] : memref<1x1x128xf32, #tpu.memory_space<vmem>>, vector<1x1x128xf32>
    tpu.vector_store %arg4[%c0_3, %c0_4, %c0_5], %4 {strides = array<i32>} : memref<1x1x128xf32, #tpu.memory_space<vmem>>, vector<1x1x128xf32>,
    return
  }
  func.func @transform_0(%arg0: i32, %arg1: i32) -> (i32, i32) {
    %c0_i32 = arith.constant 0 : i32
    return %arg0, %arg1 : i32, i32
  }
  func.func @transform_1(%arg0: i32, %arg1: i32) -> (i32, i32) {
    %c0_i32 = arith.constant 0 : i32
    return %arg0, %arg1 : i32, i32
  }
  func.func @transform_2(%arg0: i32, %arg1: i32) -> (i32, i32, i32) {
    %c0_i32 = arith.constant 0 : i32
    %c0_i32_0 = arith.constant 0 : i32
    return %arg0, %c0_i32, %arg1 : i32, i32, i32
  }
}

</mosaic_0001>

<bundles_post_ra>
// kernel: tpu_custom_call.1
= control target key start
LH: loop header
LB: loop body
LE: loop exit
PB: predicated region body
PF: predicated region fallthrough
CT: control target
= control target key end

     0   :  { %7 = vsyncpa [#allocation3], 0  ;;  %s176_s0 = inlined_call_operand.hbm [shape: f32[8,128], index: 0, kind: input, shape index: {}]   ;;  %s177_s1 = inlined_call_operand.hbm [shape: f32[8,128], index: 1, kind: input, shape index: {}]   ;;  %s178_s2 = inlined_call_operand.hbm [shape: f32[1,1,128], index: 2, kind: output, shape index: {}]  }
   0x1   :  { %8 = vsyncpa [#allocation6], 0 }
   0x2   :  { %9 = vsyncpa [#allocation4], 0  ;;  %s15_s11 = sshll.u32 %s176_s0, 4  ;;  %s149_s12 = smov [#allocation2]   ;;  %s16_s11 = int_to_ptr.hbm [resolvable:$true] %s15_s11 }
   0x3   :  { %s17_s13 = sshll.u32 %s149_s12, 4  ;;  %s26_s16 = sshll.u32 %s177_s1, 4  ;;  %s18_s13 = int_to_ptr.vmem [resolvable:$true] %s17_s13  ;;  %s27_s16 = int_to_ptr.hbm [resolvable:$true] %s26_s16 }
   0x4   :  { %20 = dma.hbm_to_vmem [thread:$0]  %s16_s11, 128, %s18_s13, [#allocation3]  }
   0x5   :  { %s150_s17 = smov [#allocation5]  }
   0x6   :  { %s28_s18 = sshll.u32 %s150_s17, 4  ;;  %s29_s18 = int_to_ptr.vmem [resolvable:$true] %s28_s18 }
   0x7   :  { %31 = dma.hbm_to_vmem [thread:$0]  %s27_s16, 128, %s29_s18, [#allocation6]  }
   0x8   :  { %143 = dma.done.wait [#allocation3], 128  }
   0x9   :  { %144 = vsyncadd [#allocation3], 4294967168 }
   0xa   :  { %145 = dma.done.wait [#allocation6], 128  }
   0xb   :  { %146 = vsyncadd [#allocation6], 4294967168  ;;  %v40_v0 = vld [vmem:[#allocation2] sm:$0xff]  ;;  %v41_v1 = vld [vmem:[#allocation5] sm:$0xff]  ;;  %s151_s0 = smov [#allocation7]   ;;  %s57_s21 = sshll.u32 %s178_s2, 4  ;;  %s58_s21 = int_to_ptr.hbm [resolvable:$true] %s57_s21 }
   0xc   :  { %v42_v2 = vmul.f32 %v41_v1, %v40_v0  ;;  %s55_s19 = sshll.u32 %s151_s0, 4  ;;  %s56_s19 = int_to_ptr.vmem [resolvable:$true] %s55_s19 }
   0xe   :  { %v43_v3 = vrot.slane %v42_v2, 4 }
  0x10   :  { %v44_v4 = vadd.f32 %v43_v3, %v42_v2 }
  0x12   :  { %v45_v5 = vrot.slane %v44_v4, 2 }
  0x14   :  { %v46_v6 = vadd.f32 %v45_v5, %v44_v4 }
  0x16   :  { %v47_v7 = vrot.slane %v46_v6, 1 }
  0x18   :  { %v48_v8 = vadd.f32 %v47_v7, %v46_v6 }
  0x1a   :  { %49 = vst [vmem:[#allocation7] sm:$0x1] %v48_v8 }
  0x1b   :  { %60 = dma.vmem_to_hbm [thread:$0]  %s56_s19, 16, %s58_s21, [#allocation4]  }
  0x1c   :  { %147 = dma.done.wait [#allocation4], 16  }
  0x1d   :  { %148 = vsyncadd [#allocation4], 4294967280 }
  0x1e   :  { %65 = vsyncpa [#allocation3], 1 }
  0x1f   :  { %66 = vsyncpa [#allocation6], 1 }
  0x20   :  { %67 = vsyncpa [#allocation4], 1 }

</bundles_post_ra>
